<compile_context>
chip_gen: v7x
topology: tpu7x:2x2x1
jax: 0.10.0
libtpu: 0.0.40
codegen_flags: <defaults>
</compile_context>

<pallas_src>
import math

import jax
import jax.numpy as jnp
from jax.experimental import pallas as pl
from jax.experimental.pallas import tpu as pltpu


def lambda_init_fn(depth):
    return 0.8 - 0.6 * math.exp(-0.3 * depth)


def _pick_tile(dim, pref, align):
    """Largest power-of-two tile <= pref that divides dim and is >= align,
    else the full dim (a full-extent block is always legal)."""
    t = pref
    while t >= align:
        if dim % t == 0:
            return t
        t //= 2
    return dim


# ----------------------------- tiled matmul --------------------------------

def _matmul_kernel(x_ref, w_ref, o_ref, acc_ref):
    @pl.when(pl.program_id(2) == 0)
    def _():
        acc_ref[...] = jnp.zeros_like(acc_ref)

    acc_ref[...] += jnp.dot(
        x_ref[...], w_ref[...], preferred_element_type=jnp.float32
    )

    @pl.when(pl.program_id(2) == pl.num_programs(2) - 1)
    def _():
        o_ref[...] = acc_ref[...].astype(o_ref.dtype)


def pallas_matmul(x, w, *, out_dtype=None, tm_pref=512, tn_pref=512,
                  tk_pref=256):
    """x: (M, K) @ w: (K, N) -> (M, N). bf16 MXU operands, f32 accumulation."""
    M, K = x.shape
    K2, N = w.shape
    assert K == K2
    out_dtype = x.dtype if out_dtype is None else out_dtype
    tm = _pick_tile(M, tm_pref, 8)
    tn = _pick_tile(N, tn_pref, 128)
    tk = _pick_tile(K, tk_pref, 128)
    grid = (M // tm, N // tn, K // tk)
    return pl.pallas_call(
        _matmul_kernel,
        out_shape=jax.ShapeDtypeStruct((M, N), out_dtype),
        grid=grid,
        in_specs=[
            pl.BlockSpec((tm, tk), lambda i, j, k: (i, k)),
            pl.BlockSpec((tk, tn), lambda i, j, k: (k, j)),
        ],
        out_specs=pl.BlockSpec((tm, tn), lambda i, j, k: (i, j)),
        scratch_shapes=[pltpu.VMEM((tm, tn), jnp.float32)],
        compiler_params=pltpu.CompilerParams(
            dimension_semantics=("parallel", "parallel", "arbitrary")),
    )(x, w)


# ------------------------ differential attention ----------------------------

def _make_diff_attn_kernel(eps, head_dim, n_rep):
    Dh = head_dim
    D2 = 2 * Dh

    def kernel(lam_ref, q_ref, k_ref, v_ref, g_ref, out_ref, aw_ref):
        # lam_ref: (1,) f32 SMEM
        # q_ref:   (tq, n_rep*2Dh) bf16   n_rep diff-heads sharing one KV head
        # k_ref:   (S, 2Dh) bf16          this KV head's two key components
        # v_ref:   (S, 2Dh) bf16
        # g_ref:   (1, 2Dh) f32           RMSNorm gamma * (1 - lambda_init)
        # out_ref: (tq, n_rep*2Dh) bf16   written directly in (B,T,E) layout
        # aw_ref:  (n_rep, tq, S) bf16
        lam = lam_ref[0]
        k = k_ref[...]
        v = v_ref[...]
        g = g_ref[...]
        k_comp = (k[:, :Dh], k[:, Dh:])     # key component-heads 2u, 2u+1

        dn = (((1,), (1,)), ((), ()))       # (tq,Dh) @ (S,Dh)^T -> (tq,S)
        outs = []
        for r in range(n_rep):
            # torch repeat_interleave semantics: q component-head c pairs with
            # k component-head c // n_rep.
            q1 = q_ref[:, (2 * r) * Dh:(2 * r + 1) * Dh]
            q2 = q_ref[:, (2 * r + 1) * Dh:(2 * r + 2) * Dh]
            k1 = k_comp[(2 * r) // n_rep]
            k2 = k_comp[(2 * r + 1) // n_rep]

            # softmax 1 (finish before softmax 2: fewer live (tq,S) f32 temps)
            s = jax.lax.dot_general(q1, k1, dn,
                                    preferred_element_type=jnp.float32)
            s = jnp.exp(s - jnp.max(s, axis=-1, keepdims=True))
            p = s * pl.reciprocal(jnp.sum(s, axis=-1, keepdims=True),
                                  approx=True)
            # softmax 2, lambda folded into its inverse, subtract in place
            s = jax.lax.dot_general(q2, k2, dn,
                                    preferred_element_type=jnp.float32)
            s = jnp.exp(s - jnp.max(s, axis=-1, keepdims=True))
            p = p - s * (lam * pl.reciprocal(
                jnp.sum(s, axis=-1, keepdims=True), approx=True))
            # TODO(synk): additive attn_mask / nan_to_num path not implemented
            # (reference forward never applies a mask, so it is the identity).
            aw_ref[r] = p.astype(aw_ref.dtype)

            attn = jnp.dot(p.astype(v.dtype), v,
                           preferred_element_type=jnp.float32)
            ms = jnp.mean(attn * attn, axis=-1, keepdims=True)
            outs.append(attn * jax.lax.rsqrt(ms + eps) * g)

        out_ref[...] = jnp.concatenate(outs, axis=-1).astype(out_ref.dtype)

    return kernel


def diff_attention(q, k, v, gamma_scaled, lam_full, *, n_rep, eps=1e-5,
                   tq_pref=256):
    """q: (B, T, H*2Dh) bf16 (projection layout, NOT head-major);
    k, v: (B, Hkv, S, 2Dh) bf16; gamma: (1, 2Dh) f32; lam: (1,) f32."""
    B, T, E = q.shape
    _, Hkv, S, D2 = k.shape
    Dh = D2 // 2
    H = Hkv * n_rep
    G = n_rep * D2                       # lanes per KV-head group of q / output
    assert Hkv * G == E
    # (8,128) legality of the lane-dense q / output block.
    assert G % 128 == 0 or G == E, (
        "n_rep * 2 * head_dim must be a multiple of 128 (or the full embed dim)")

    tq = _pick_tile(T, tq_pref, 8)
    grid = (B, Hkv, T // tq)
    kernel = _make_diff_attn_kernel(eps, Dh, n_rep)

    in_specs = [
        pl.BlockSpec(memory_space=pltpu.MemorySpace.SMEM),                 # lam
        pl.BlockSpec((None, tq, G), lambda b, g, i: (b, i, g)),            # q
        pl.BlockSpec((None, None, S, D2), lambda b, g, i: (b, g, 0, 0)),   # k
        pl.BlockSpec((None, None, S, D2), lambda b, g, i: (b, g, 0, 0)),   # v
        pl.BlockSpec((1, D2), lambda b, g, i: (0, 0)),                     # gamma
    ]
    out_specs = (
        pl.BlockSpec((None, tq, G), lambda b, g, i: (b, i, g)),            # attn
        pl.BlockSpec((None, n_rep, tq, S), lambda b, g, i: (b, g, i, 0)),  # aw
    )
    out_shape = (
        jax.ShapeDtypeStruct((B, T, E), q.dtype),
        jax.ShapeDtypeStruct((B, H, T, S), jnp.bfloat16),
    )
    return pl.pallas_call(
        kernel,
        grid=grid,
        in_specs=in_specs,
        out_specs=out_specs,
        out_shape=out_shape,
        compiler_params=pltpu.CompilerParams(
            dimension_semantics=("parallel", "parallel", "parallel"),
            vmem_limit_bytes=48 * 1024 * 1024),
    )(lam_full, q, k, v, gamma_scaled)


# --------------------------- Module (JAX wrapper) ---------------------------

class MultiheadDiffAttnPallas:
    def __init__(self, model_parallel_size, decoder_kv_attention_heads,
                 embed_dim, depth, num_heads, key):
        self.embed_dim = embed_dim
        self.num_heads = num_heads // model_parallel_size
        self.num_kv_heads = (decoder_kv_attention_heads // model_parallel_size
                             if decoder_kv_attention_heads is not None
                             else num_heads // model_parallel_size)
        self.n_rep = self.num_heads // self.num_kv_heads
        self.head_dim = embed_dim // num_heads // 2
        self.scaling = self.head_dim ** (-0.5)
        self.lambda_init = lambda_init_fn(depth)

        ks = jax.random.split(key, 8)

        def linw_t(k, in_f, out_f, scale=1.0):
            # Stored pre-transposed (in, out) and in bf16 for the MXU.
            w = jax.random.normal(k, (in_f, out_f), jnp.float32) * 0.02 * scale
            return w.astype(jnp.bfloat16)

        # q scaling (head_dim^-0.5) is folded into the q projection weight.
        self.wq_t = linw_t(ks[0], embed_dim, embed_dim, scale=self.scaling)
        self.wk_t = linw_t(ks[1], embed_dim, embed_dim // self.n_rep)
        self.wv_t = linw_t(ks[2], embed_dim, embed_dim // self.n_rep)
        self.wo_t = linw_t(ks[3], embed_dim, embed_dim)
        self.lambda_q1 = jax.random.normal(ks[4], (self.head_dim,), jnp.float32) * 0.1
        self.lambda_k1 = jax.random.normal(ks[5], (self.head_dim,), jnp.float32) * 0.1
        self.lambda_q2 = jax.random.normal(ks[6], (self.head_dim,), jnp.float32) * 0.1
        self.lambda_k2 = jax.random.normal(ks[7], (self.head_dim,), jnp.float32) * 0.1
        self.subln_weight = jnp.ones((2 * self.head_dim,), jnp.float32)

    def __call__(self, x, rel_pos=None, attn_mask=None):
        # rel_pos is unused by the reference forward.
        assert attn_mask is None, "TODO(synk): additive attn_mask not implemented"
        B, T, E = x.shape
        H, Hkv, Dh = self.num_heads, self.num_kv_heads, self.head_dim

        xf = x.astype(jnp.bfloat16).reshape(B * T, E)
        # Projections (bf16 MXU, f32 accumulation).  q stays in (B, T, E) layout
        # (no head-major transpose); the attention BlockSpec slices head groups.
        q = pallas_matmul(xf, self.wq_t).reshape(B, T, E)
        k = pallas_matmul(xf, self.wk_t).reshape(B, T, Hkv, 2 * Dh)
        v = pallas_matmul(xf, self.wv_t).reshape(B, T, Hkv, 2 * Dh)
        # K/V are the small (E/n_rep-lane) tensors; head-major layout keeps the
        # kernel's K/V blocks full-extent.  TODO(synk): fuse this transpose into
        # the projection out_spec to also save this read+write.
        k = jnp.transpose(k, (0, 2, 1, 3))   # (B, Hkv, S, 2Dh)
        v = jnp.transpose(v, (0, 2, 1, 3))

        lam1 = jnp.exp(jnp.sum(self.lambda_q1 * self.lambda_k1))
        lam2 = jnp.exp(jnp.sum(self.lambda_q2 * self.lambda_k2))
        lam_full = (lam1 - lam2 + self.lambda_init).reshape(1).astype(jnp.float32)
        gamma_scaled = (self.subln_weight * (1.0 - self.lambda_init)
                        ).reshape(1, 2 * Dh).astype(jnp.float32)

        attn, attn_weights = diff_attention(
            q, k, v, gamma_scaled, lam_full, n_rep=self.n_rep)

        # attn is already (B, T, H*2Dh): feed the output projection directly.
        out = pallas_matmul(attn.reshape(B * T, H * 2 * Dh), self.wo_t,
                            out_dtype=jnp.float32).reshape(B, T, E)
        return out, attn_weights


# --------------------------- pure-JAX reference -----------------------------

def reference_forward(mod, x):
    """f32 reference that follows the PyTorch module exactly (including GQA
    repeat_interleave semantics).  Weights/input share the kernel's bf16
    rounding so the comparison isolates the kernel's own arithmetic."""
    f32 = jnp.float32
    B, T, E = x.shape
    S = T
    H, Hkv, Dh, n_rep = mod.num_heads, mod.num_kv_heads, mod.head_dim, mod.n_rep
    xb = x.astype(jnp.bfloat16).astype(f32)
    wq = mod.wq_t.astype(f32)   # q scaling already folded in
    wk = mod.wk_t.astype(f32)
    wv = mod.wv_t.astype(f32)
    wo = mod.wo_t.astype(f32)

    q = (xb @ wq).reshape(B, T, 2 * H, Dh).transpose(0, 2, 1, 3)
    k = (xb @ wk).reshape(B, S, 2 * Hkv, Dh).transpose(0, 2, 1, 3)
    v = (xb @ wv).reshape(B, S, Hkv, 2 * Dh).transpose(0, 2, 1, 3)
    k = jnp.repeat(k, n_rep, axis=1)    # torch repeat_interleave along heads
    v = jnp.repeat(v, n_rep, axis=1)

    aw = jnp.einsum('bctd,bcsd->bcts', q, k)   # c: 2H component heads
    aw = jax.nn.softmax(aw, axis=-1)
    lam1 = jnp.exp(jnp.sum(mod.lambda_q1 * mod.lambda_k1))
    lam2 = jnp.exp(jnp.sum(mod.lambda_q2 * mod.lambda_k2))
    lam_full = lam1 - lam2 + mod.lambda_init
    aw = aw.reshape(B, H, 2, T, S)
    aw = aw[:, :, 0] - lam_full * aw[:, :, 1]
    attn = jnp.einsum('bhts,bhsd->bhtd', aw, v)
    ms = jnp.mean(attn ** 2, axis=-1, keepdims=True)
    attn = attn * jax.lax.rsqrt(ms + 1e-5) * mod.subln_weight
    attn = attn * (1.0 - mod.lambda_init)
    attn = attn.transpose(0, 2, 1, 3).reshape(B, T, H * 2 * Dh)
    out = attn @ wo
    return out, aw


# --------------------------------- main -------------------------------------

if __name__ == "__main__":
    key = jax.random.PRNGKey(0)
    kp, kx = jax.random.split(key)

    B, T = 2, 16
    embed_dim, num_heads, kv_heads, depth = 256, 4, 2, 2   # head_dim=32, n_rep=2

    mod = MultiheadDiffAttnPallas(
        model_parallel_size=1,
        decoder_kv_attention_heads=kv_heads,
        embed_dim=embed_dim,
        depth=depth,
        num_heads=num_heads,
        key=kp,
    )
    x = jax.random.normal(kx, (B, T, embed_dim), jnp.float32)

    out, attn_weights = mod(x)                 # rel_pos / attn_mask unused
    jax.block_until_ready((out, attn_weights))

    ref_out, ref_aw = reference_forward(mod, x)
    assert out.shape == (B, T, embed_dim)
    assert attn_weights.shape == (B, num_heads, T, T)
    out_err = float(jnp.max(jnp.abs(out.astype(jnp.float32) - ref_out)))
    aw_err = float(jnp.max(jnp.abs(attn_weights.astype(jnp.float32) - ref_aw)))
    # bf16 MXU operands + bf16 attn_weights output -> bf16-level tolerances.
    assert jnp.allclose(out.astype(jnp.float32), ref_out,
                        atol=3e-2, rtol=3e-2), f"out max err {out_err}"
    assert jnp.allclose(attn_weights.astype(jnp.float32), ref_aw,
                        atol=1e-2, rtol=1e-2), f"aw max err {aw_err}"

    print("KERNEL_OK")
</pallas_src>

<mosaic_0001>
module attributes {stable_mosaic.version = 11 : i64} {
  func.func @_matmul_kernel(%arg0: i32, %arg1: i32, %arg2: i32, %arg3: memref<32x256xbf16, #tpu.memory_space<vmem>>, %arg4: memref<256x256xbf16, #tpu.memory_space<vmem>>, %arg5: memref<32x256xbf16, #tpu.memory_space<vmem>>, %arg6: memref<32x256xf32, #tpu.memory_space<vmem>>) attributes {dimension_semantics = [#tpu.dimension_semantics<parallel>, #tpu.dimension_semantics<parallel>, #tpu.dimension_semantics<arbitrary>], iteration_bounds = array<i64: 1, 1, 1>, scalar_prefetch = 0 : i64, scratch_operands = 1 : i64, tpu.core_type = #tpu.core_type<tc>, window_params = [{transform_indices = @transform_0, window_bounds = array<i64: 32, 256>}, {transform_indices = @transform_1, window_bounds = array<i64: 256, 256>}, {transform_indices = @transform_2, window_bounds = array<i64: 32, 256>}]} {
    %c0_i32 = arith.constant 0 : i32
    %0 = arith.cmpi eq, %arg2, %c0_i32 : i32
    %1 = arith.extui %0 : i1 to i32
    %c0_i32_0 = arith.constant 0 : i32
    %2 = arith.cmpi ne, %1, %c0_i32_0 : i32
    scf.if %2 {
      %cst_10 = arith.constant 0.000000e+00 : f32
      %12 = vector.broadcast %cst_10 : f32 to vector<32x256xf32>
      %c0_11 = arith.constant 0 : index
      %c0_12 = arith.constant 0 : index
      %13 = vector.load %arg6[%c0_11, %c0_12] : memref<32x256xf32, #tpu.memory_space<vmem>>, vector<32x256xf32>
      tpu.vector_store %arg6[%c0_11, %c0_12], %12 {strides = array<i32>} : memref<32x256xf32, #tpu.memory_space<vmem>>, vector<32x256xf32>,
    } else {
    }
    %c0 = arith.constant 0 : index
    %c0_1 = arith.constant 0 : index
    %3 = vector.load %arg6[%c0, %c0_1] : memref<32x256xf32, #tpu.memory_space<vmem>>, vector<32x256xf32>
    %c0_2 = arith.constant 0 : index
    %c0_3 = arith.constant 0 : index
    %4 = vector.load %arg3[%c0_2, %c0_3] : memref<32x256xbf16, #tpu.memory_space<vmem>>, vector<32x256xbf16>
    %c0_4 = arith.constant 0 : index
    %c0_5 = arith.constant 0 : index
    %5 = vector.load %arg4[%c0_4, %c0_5] : memref<256x256xbf16, #tpu.memory_space<vmem>>, vector<256x256xbf16>
    %cst = arith.constant dense<0.000000e+00> : vector<32x256xf32>
    %6 = tpu.matmul %4, %5, %cst {dimension_numbers = #tpu.dot_dimension_numbers<[1], [0], [0], [1], [0, 0, 1, 1], [], []>} : vector<32x256xbf16>, vector<256x256xbf16>, vector<32x256xf32> -> vector<32x256xf32>
    %7 = arith.addf %3, %6 : vector<32x256xf32>
    %c0_6 = arith.constant 0 : index
    %c0_7 = arith.constant 0 : index
    %8 = vector.load %arg6[%c0_6, %c0_7] : memref<32x256xf32, #tpu.memory_space<vmem>>, vector<32x256xf32>
    tpu.vector_store %arg6[%c0_6, %c0_7], %7 {strides = array<i32>} : memref<32x256xf32, #tpu.memory_space<vmem>>, vector<32x256xf32>,
    %c0_i32_8 = arith.constant 0 : i32
    %9 = arith.cmpi eq, %arg2, %c0_i32_8 : i32
    %10 = arith.extui %9 : i1 to i32
    %c0_i32_9 = arith.constant 0 : i32
    %11 = arith.cmpi ne, %10, %c0_i32_9 : i32
    scf.if %11 {
      %c0_10 = arith.constant 0 : index
      %c0_11 = arith.constant 0 : index
      %12 = vector.load %arg6[%c0_10, %c0_11] : memref<32x256xf32, #tpu.memory_space<vmem>>, vector<32x256xf32>
      %13 = arith.truncf %12 : vector<32x256xf32> to vector<32x256xbf16>
      %c0_12 = arith.constant 0 : index
      %c0_13 = arith.constant 0 : index
      %14 = vector.load %arg5[%c0_12, %c0_13] : memref<32x256xbf16, #tpu.memory_space<vmem>>, vector<32x256xbf16>
      tpu.vector_store %arg5[%c0_12, %c0_13], %13 {strides = array<i32>} : memref<32x256xbf16, #tpu.memory_space<vmem>>, vector<32x256xbf16>,
    } else {
    }
    return
  }
  func.func @transform_0(%arg0: i32, %arg1: i32, %arg2: i32) -> (i32, i32) {
    %c0_i32 = arith.constant 0 : i32
    return %arg0, %arg2 : i32, i32
  }
  func.func @transform_1(%arg0: i32, %arg1: i32, %arg2: i32) -> (i32, i32) {
    %c0_i32 = arith.constant 0 : i32
    return %arg2, %arg1 : i32, i32
  }
  func.func @transform_2(%arg0: i32, %arg1: i32, %arg2: i32) -> (i32, i32) {
    %c0_i32 = arith.constant 0 : i32
    return %arg0, %arg1 : i32, i32
  }
}

</mosaic_0001>

<bundles_post_ra>
// kernel: tpu_custom_call.1
= control target key start
LH: loop header
LB: loop body
LE: loop exit
PB: predicated region body
PF: predicated region fallthrough
CT: control target
= control target key end

     0   :  { %7 = vsyncpa [#allocation4], 0  ;;  %s674_s0 = inlined_call_operand.hbm [shape: bf16[32,256], index: 0, kind: input, shape index: {}]   ;;  %s675_s1 = inlined_call_operand.hbm [shape: bf16[256,256], index: 1, kind: input, shape index: {}]   ;;  %s676_s2 = inlined_call_operand.hbm [shape: bf16[32,256], index: 2, kind: output, shape index: {}]  }
   0x1   :  { %8 = vsyncpa [#allocation7], 0 }
   0x2   :  { %9 = vsyncpa [#allocation5], 0  ;;  %s609_s9 = smov [#allocation3]   ;;  %s537_s13 = scalar_lea.hbm %s674_s0, 512 }
   0x3   :  { %s15_s10 = sshll.u32 %s609_s9, 4  ;;  %p538_p0 = scmp.ne.s32.totalorder %s674_s0, %s537_s13  ;;  %s16_s10 = int_to_ptr.vmem [resolvable:$true] %s15_s10 }
   0x4   :  { %p541_p1 = scmp.lt.u32.totalorder %s537_s13, %s674_s0 }
   0x6   :  { %p543_p2 = pnand %p541_p1, %p538_p0 }
   0x8   :  { %546 = shalt.err (!%p543_p2)
}
   0x9   :  { %s547_s18 = scalar_lea.vmem %s16_s10, 512  ;;  %p552_p4 = scmp.lt.s32.totalorder %s16_s10, %s16_s10 }
   0xa   :  { %p548_p3 = scmp.ne.s32.totalorder %s16_s10, %s547_s18  ;;  %p553_p5 = scmp.lt.s32.totalorder %s547_s18, %s547_s18 }
   0xc   :  { %p554_p6 = por %p553_p5, %p552_p4 }
   0xe   :  { %p555_p7 = pnand %p554_p6, %p548_p3 }
  0x10   :  { %558 = shalt.err (!%p555_p7)
}
  0x11   :  { %s610_s19 = smov 128   ;;  %s611_s20 = smov 8  }
  0x12   :  { %21 = dma.hbm_to_vmem [thread:$0]  %s674_s0, 512, %s16_s10, [#allocation4], %s610_s19, %s610_s19, %s611_s20  }
  0x13   :  { %s612_s23 = smov [#allocation6]   ;;  %s559_s27 = scalar_lea.hbm %s675_s1, 4096 }
  0x14   :  { %s27_s24 = sshll.u32 %s612_s23, 4  ;;  %p560_p8 = scmp.ne.s32.totalorder %s675_s1, %s559_s27  ;;  %s28_s24 = int_to_ptr.vmem [resolvable:$true] %s27_s24 }
  0x15   :  { %p563_p9 = scmp.lt.u32.totalorder %s559_s27, %s675_s1 }
  0x17   :  { %p565_p10 = pnand %p563_p9, %p560_p8 }
  0x19   :  { %568 = shalt.err (!%p565_p10)
}
  0x1a   :  { %s569_s4 = scalar_lea.vmem %s28_s24, 4096  ;;  %p574_p12 = scmp.lt.s32.totalorder %s28_s24, %s28_s24 }
  0x1b   :  { %p570_p11 = scmp.ne.s32.totalorder %s28_s24, %s569_s4  ;;  %p575_p13 = scmp.lt.s32.totalorder %s569_s4, %s569_s4 }
  0x1d   :  { %p576_p0 = por %p575_p13, %p574_p12 }
  0x1f   :  { %p577_p1 = pnand %p576_p0, %p570_p11 }
  0x21   :  { %580 = shalt.err (!%p577_p1)
}
  0x22   :  { %33 = dma.hbm_to_vmem [thread:$0]  %s675_s1, 4096, %s28_s24, [#allocation7], %s610_s19, %s610_s19, %s611_s20  }
  0x23   :  { %603 = dma.done.wait [#allocation4], 512  }
  0x24   :  { %604 = vsyncadd [#allocation4], 4294966784 }
  0x25   :  { %605 = dma.done.wait [#allocation7], 4096  }
  0x26   :  { %606 = vsyncadd [#allocation7], 4294963200  ;;  %v483_v0 = vld [vmem:[#allocation6 + $0x4] ss:$8 sps:$4 sm:$0xff]   ;;  %v485_v1 = vld [vmem:[#allocation6] ss:$8 sps:$4 sm:$0xff]  }
  0x27   :  { %276 = vmatprep.subr.bf16.mxu0 %v483_v0  ;;  %446 = vmatprep.subr.bf16.mxu1 %v483_v0  ;;  %v486_v2 = vld [vmem:[#allocation6 + $0x14] ss:$8 sps:$4 sm:$0xff]   ;;  %v488_v3 = vld [vmem:[#allocation6 + $0x10] ss:$8 sps:$4 sm:$0xff]   ;;  %v489_v4 = vld [vmem:[#allocation6 + $0x24] ss:$8 sps:$4 sm:$0xff]  }
  0x28   :  { %277 = vmatpush1.bf16.msra.mxu0 %v485_v1  ;;  %462 = vmatpush1.bf16.msra.mxu1 %v485_v1  ;;  %v491_v5 = vld [vmem:[#allocation6 + $0x20] ss:$8 sps:$4 sm:$0xff]   ;;  %v492_v6 = vld [vmem:[#allocation6 + $0x34] ss:$8 sps:$4 sm:$0xff]   ;;  %v494_v7 = vld [vmem:[#allocation6 + $0x30] ss:$8 sps:$4 sm:$0xff]  }
  0x29   :  { %278 = vmatprep.subr.bf16.mxu0 %v486_v2  ;;  %447 = vmatprep.subr.bf16.mxu1 %v486_v2  ;;  %v495_v8 = vld [vmem:[#allocation6 + $0x44] ss:$8 sps:$4 sm:$0xff]   ;;  %v497_v9 = vld [vmem:[#allocation6 + $0x40] ss:$8 sps:$4 sm:$0xff]   ;;  %v498_v10 = vld [vmem:[#allocation6 + $0x54] ss:$8 sps:$4 sm:$0xff]  }
  0x2a   :  { %v500_v11 = vld [vmem:[#allocation6 + $0x50] ss:$8 sps:$4 sm:$0xff]   ;;  %v501_v12 = vld [vmem:[#allocation6 + $0x64] ss:$8 sps:$4 sm:$0xff]   ;;  %v503_v14 = vld [vmem:[#allocation6 + $0x60] ss:$8 sps:$4 sm:$0xff]  }
  0x2b   :  { %v533_v13 = vld [vmem:[#allocation3 + $0x4] ss:$8 sps:$4 sm:$0xff]   ;;  %v536_v15 = vld [vmem:[#allocation3 + $0x14] ss:$8 sps:$4 sm:$0xff]   ;;  %v506_v17 = vld [vmem:[#allocation6 + $0x70] ss:$8 sps:$4 sm:$0xff]  }
  0x2c   :  { %279 = vmatpush1.bf16.msra.mxu0 %v488_v3  ;;  %463 = vmatpush1.bf16.msra.mxu1 %v488_v3  ;;  %v504_v16 = vld [vmem:[#allocation6 + $0x74] ss:$8 sps:$4 sm:$0xff]   ;;  %v507_v18 = vld [vmem:[#allocation6 + $0x84] ss:$8 sps:$4 sm:$0xff]   ;;  %v509_v19 = vld [vmem:[#allocation6 + $0x80] ss:$8 sps:$4 sm:$0xff]  }
  0x2d   :  { %280 = vmatprep.subr.bf16.mxu0 %v489_v4  ;;  %448 = vmatprep.subr.bf16.mxu1 %v489_v4  ;;  %v510_v20 = vld [vmem:[#allocation6 + $0x94] ss:$8 sps:$4 sm:$0xff]   ;;  %v512_v21 = vld [vmem:[#allocation6 + $0x90] ss:$8 sps:$4 sm:$0xff]   ;;  %v513_v22 = vld [vmem:[#allocation6 + $0xa4] ss:$8 sps:$4 sm:$0xff]  }
  0x2e   :  { %308 = vmatprep.mubr.bf16.mxu0 %v533_v13  ;;  %318 = vmatprep.mubr.bf16.mxu1 %v536_v15  ;;  %v515_v23 = vld [vmem:[#allocation6 + $0xa0] ss:$8 sps:$4 sm:$0xff]   ;;  %v516_v24 = vld [vmem:[#allocation6 + $0xb4] ss:$8 sps:$4 sm:$0xff]   ;;  %v518_v25 = vld [vmem:[#allocation6 + $0xb0] ss:$8 sps:$4 sm:$0xff]  }
  0x2f   :  { %v519_v26 = vld [vmem:[#allocation6 + $0xc4] ss:$8 sps:$4 sm:$0xff]   ;;  %v521_v27 = vld [vmem:[#allocation6 + $0xc0] ss:$8 sps:$4 sm:$0xff]   ;;  %v522_v28 = vld [vmem:[#allocation6 + $0xd4] ss:$8 sps:$4 sm:$0xff]  }
  0x30   :  { %281 = vmatpush1.bf16.msra.mxu0 %v491_v5  ;;  %464 = vmatpush1.bf16.msra.mxu1 %v491_v5  ;;  %v524_v29 = vld [vmem:[#allocation6 + $0xd0] ss:$8 sps:$4 sm:$0xff]   ;;  %v525_v30 = vld [vmem:[#allocation6 + $0xe4] ss:$8 sps:$4 sm:$0xff]   ;;  %v527_v31 = vld [vmem:[#allocation6 + $0xe0] ss:$8 sps:$4 sm:$0xff]  }
  0x31   :  { %282 = vmatprep.subr.bf16.mxu0 %v492_v6  ;;  %449 = vmatprep.subr.bf16.mxu1 %v492_v6  ;;  %v528_v32 = vld [vmem:[#allocation6 + $0xf4] ss:$8 sps:$4 sm:$0xff]   ;;  %v530_v33 = vld [vmem:[#allocation6 + $0xf0] ss:$8 sps:$4 sm:$0xff]   ;;  %v531_v34 = vld [vmem:[#allocation3] ss:$8 sps:$4 sm:$0xff]  }
  0x32   :  { %v534_v35 = vld [vmem:[#allocation3 + $0x10] ss:$8 sps:$4 sm:$0xff]   ;;  %s613_s1 = smov [#allocation8]  }
  0x33   :  { %s389_s6 = sshll.u32 %s613_s1, 4  ;;  %s390_s6 = int_to_ptr.vmem [resolvable:$true] %s389_s6 }
  0x34   :  { %283 = vmatpush1.bf16.msra.mxu0 %v494_v7  ;;  %465 = vmatpush1.bf16.msra.mxu1 %v494_v7  ;;  %s581_s7 = scalar_lea.vmem %s390_s6, 512  ;;  %p586_p3 = scmp.lt.s32.totalorder %s390_s6, %s390_s6 }
  0x35   :  { %284 = vmatprep.subr.bf16.mxu0 %v495_v8  ;;  %450 = vmatprep.subr.bf16.mxu1 %v495_v8  ;;  %p582_p2 = scmp.ne.s32.totalorder %s390_s6, %s581_s7  ;;  %p587_p4 = scmp.lt.s32.totalorder %s581_s7, %s581_s7 }
  0x37   :  { %p588_p5 = por %p587_p4, %p586_p3 }
  0x38   :  { %285 = vmatpush1.bf16.msra.mxu0 %v497_v9  ;;  %466 = vmatpush1.bf16.msra.mxu1 %v497_v9 }
  0x39   :  { %286 = vmatprep.subr.bf16.mxu0 %v498_v10  ;;  %451 = vmatprep.subr.bf16.mxu1 %v498_v10  ;;  %p589_p6 = pnand %p588_p5, %p582_p2 }
  0x3c   :  { %287 = vmatpush1.bf16.msra.mxu0 %v500_v11  ;;  %467 = vmatpush1.bf16.msra.mxu1 %v500_v11 }
  0x3d   :  { %288 = vmatprep.subr.bf16.mxu0 %v501_v12  ;;  %452 = vmatprep.subr.bf16.mxu1 %v501_v12 }
  0x40   :  { %289 = vmatpush1.bf16.msra.mxu0 %v503_v14  ;;  %468 = vmatpush1.bf16.msra.mxu1 %v503_v14 }
  0x41   :  { %290 = vmatprep.subr.bf16.mxu0 %v504_v16  ;;  %453 = vmatprep.subr.bf16.mxu1 %v504_v16 }
  0x44   :  { %291 = vmatpush1.bf16.msra.mxu0 %v506_v17  ;;  %469 = vmatpush1.bf16.msra.mxu1 %v506_v17 }
  0x45   :  { %292 = vmatprep.subr.bf16.mxu0 %v507_v18  ;;  %454 = vmatprep.subr.bf16.mxu1 %v507_v18 }
  0x48   :  { %293 = vmatpush1.bf16.msra.mxu0 %v509_v19  ;;  %470 = vmatpush1.bf16.msra.mxu1 %v509_v19 }
  0x49   :  { %294 = vmatprep.subr.bf16.mxu0 %v510_v20  ;;  %455 = vmatprep.subr.bf16.mxu1 %v510_v20 }
  0x4c   :  { %295 = vmatpush1.bf16.msra.mxu0 %v512_v21  ;;  %471 = vmatpush1.bf16.msra.mxu1 %v512_v21 }
  0x4d   :  { %296 = vmatprep.subr.bf16.mxu0 %v513_v22  ;;  %456 = vmatprep.subr.bf16.mxu1 %v513_v22 }
  0x50   :  { %297 = vmatpush1.bf16.msra.mxu0 %v515_v23  ;;  %472 = vmatpush1.bf16.msra.mxu1 %v515_v23 }
  0x51   :  { %298 = vmatprep.subr.bf16.mxu0 %v516_v24  ;;  %457 = vmatprep.subr.bf16.mxu1 %v516_v24 }
  0x54   :  { %299 = vmatpush1.bf16.msra.mxu0 %v518_v25  ;;  %473 = vmatpush1.bf16.msra.mxu1 %v518_v25 }
  0x55   :  { %300 = vmatprep.subr.bf16.mxu0 %v519_v26  ;;  %458 = vmatprep.subr.bf16.mxu1 %v519_v26 }
  0x58   :  { %301 = vmatpush1.bf16.msra.mxu0 %v521_v27  ;;  %474 = vmatpush1.bf16.msra.mxu1 %v521_v27 }
  0x59   :  { %302 = vmatprep.subr.bf16.mxu0 %v522_v28  ;;  %459 = vmatprep.subr.bf16.mxu1 %v522_v28 }
  0x5c   :  { %303 = vmatpush1.bf16.msra.mxu0 %v524_v29  ;;  %475 = vmatpush1.bf16.msra.mxu1 %v524_v29 }
  0x5d   :  { %304 = vmatprep.subr.bf16.mxu0 %v525_v30  ;;  %460 = vmatprep.subr.bf16.mxu1 %v525_v30 }
  0x60   :  { %305 = vmatpush1.bf16.msra.mxu0 %v527_v31  ;;  %476 = vmatpush1.bf16.msra.mxu1 %v527_v31 }
  0x61   :  { %306 = vmatprep.subr.bf16.mxu0 %v528_v32  ;;  %461 = vmatprep.subr.bf16.mxu1 %v528_v32 }
  0x64   :  { %307 = vmatpush1.bf16.msra.mxu0 %v530_v33  ;;  %477 = vmatpush1.bf16.msra.mxu1 %v530_v33 }
  0x67   :  { %309 = vmatmul.mubr.bf16.vlgmr.msra.gmra.mrb[0].mxu0 %v531_v34  ;;  %319 = vmatmul.mubr.bf16.vlgmr.msra.gmra.mrb[0].mxu1 %v534_v35 }
 0x13a   :  { %v310_v36 = vpop.f32.mrb[0].mxu0  ;;  %v320_v37 = vpop.f32.mrb[0].mxu1 }
 0x13b   :  { %v312_v38 = vpop.f32.mrb[1].mxu0  ;;  %v322_v39 = vpop.f32.mrb[1].mxu1 }
 0x13c   :  { %v442_v40 = vpack.c.bf16 %v312_v38, %v310_v36  ;;  %v444_v41 = vpack.c.bf16 %v322_v39, %v320_v37  ;;  %v314_v42 = vpop.f32.mrb[2].mxu0  ;;  %v324_v43 = vpop.f32.mrb[2].mxu1 }
 0x13d   :  { %v316_v44 = vpop.f32.mrb[3].mxu0  ;;  %v326_v45 = vpop.f32.mrb[3].mxu1 }
 0x13e   :  { %380 = vst [vmem:[#allocation8] sm:$0xff] %v442_v40  ;;  %382 = vst [vmem:[#allocation8 + $0x10] sm:$0xff] %v444_v41  ;;  %v443_v46 = vpack.c.bf16 %v316_v44, %v314_v42  ;;  %v445_v47 = vpack.c.bf16 %v326_v45, %v324_v43 }
 0x140   :  { %381 = vst [vmem:[#allocation8 + $0x8] sm:$0xff] %v443_v46  ;;  %383 = vst [vmem:[#allocation8 + $0x18] sm:$0xff] %v445_v47 }
 0x141   :  { %592 = shalt.err (!%p589_p6)
}
 0x142   :  { %s593_s10 = scalar_lea.hbm %s676_s2, 512 }
 0x143   :  { %p594_p7 = scmp.ne.s32.totalorder %s676_s2, %s593_s10  ;;  %p597_p8 = scmp.lt.u32.totalorder %s593_s10, %s676_s2 }
 0x145   :  { %p599_p9 = pnand %p597_p8, %p594_p7 }
 0x147   :  { %602 = shalt.err (!%p599_p9)
}
 0x148   :  { %395 = dma.vmem_to_hbm [thread:$0]  %s390_s6, 512, %s676_s2, [#allocation5], %s610_s19, %s610_s19, %s611_s20  }
 0x149   :  { %607 = dma.done.wait [#allocation5], 512  }
 0x14a   :  { %608 = vsyncadd [#allocation5], 4294966784 }
 0x14b   :  { %399 = vsyncpa [#allocation4], 1 }
 0x14c   :  { %400 = vsyncpa [#allocation7], 1 }
 0x14d   :  { %401 = vsyncpa [#allocation5], 1 }

</bundles_post_ra>
